<compile_context>
chip_gen: v7x
topology: tpu7x:2x2x1
jax: 0.10.0
libtpu: 0.0.40
codegen_flags: <defaults>
</compile_context>

<pallas_src>
import functools

import jax
import jax.numpy as jnp
from jax.experimental import pallas as pl
from jax.experimental.pallas import tpu as pltpu


def _ce_norm_kernel(logits_ref, targets_ref, mug_ref, out_ref, acc_ref, *,
                    n_total, nb_per_core):
    p = pl.program_id(0)                       # "parallel" (core) axis
    i = pl.program_id(1)                       # "arbitrary" reduction axis (batch tiles)

    @pl.when(i == 0)
    def _():
        acc_ref[...] = jnp.zeros_like(acc_ref)

    bn, c = logits_ref.shape
    gi = p * nb_per_core + i                   # global batch-tile index (unclamped)
    row0 = gi * bn

    row_ids = row0 + jax.lax.broadcasted_iota(jnp.int32, (bn, 1), 0)
    row_in = row_ids < n_total                 # (bn, 1) bool; masks ragged / OOB rows

    # Promote to f32 and zero out-of-range rows BEFORE any math: boundary-block VMEM
    # contents are undefined and could otherwise inject NaN/Inf that 0-masks don't kill.
    x = jnp.where(row_in, logits_ref[...].astype(jnp.float32), 0.0)     # (bn, C)
    mug = mug_ref[...].astype(jnp.float32)                              # (1, C)
    t = targets_ref[...]                                                # (bn, 1) i32

    valid = jnp.where(t != -1, 1.0, 0.0)       # CE ignore_index == -1
    neg = t < 0                                # negative-sample mask

    # --- softmax pieces (per row) ---
    m = jnp.max(x, axis=-1, keepdims=True)
    shifted = x - m
    lse = jnp.log(jnp.sum(jnp.exp(shifted), axis=-1, keepdims=True))    # (bn, 1)

    # --- CE pick: shifted[target]; (1, C) iota broadcast against (bn, 1) targets ---
    col = jax.lax.broadcasted_iota(jnp.int32, (1, c), 1)
    row_pick = jnp.sum(jnp.where(col == t, shifted, 0.0),
                       axis=-1, keepdims=True)                          # 0 when t < 0

    # --- norm term: neg rows -> sum((x - muG)^2); other rows -> constant sum(muG^2) ---
    d = x - mug
    row_d2 = jnp.sum(d * d, axis=-1, keepdims=True)
    smsq = jnp.sum(mug * mug, axis=-1, keepdims=True)                   # (1, 1), cheap
    norm_row = jnp.where(neg, row_d2, smsq)

    # ce_row = valid * (lse - pick); row_pick is already 0 whenever valid == 0.
    row_total = jnp.where(row_in, norm_row + valid * lse - row_pick, 0.0)
    acc_ref[...] += jnp.sum(row_total, keepdims=True)                   # (1, 1) scalar acc

    @pl.when(i == pl.num_programs(1) - 1)
    def _():
        out_ref[...] = jnp.broadcast_to(acc_ref[...], out_ref.shape)


def _tpu_vmem_capacity_bytes():
    try:
        return int(pltpu.get_tpu_info().vmem_capacity_bytes)
    except Exception:
        return 64 << 20     # conservative (v7x per-TC) default


def custom_ce_norm_loss(logits, targets, mu_g, reduction="mean",
                        block_n=None, parallel_splits=None, target_tile_bytes=None):
    """Pallas wrapper. logits: (N, C) float (any float dtype), targets: (N,) int, mu_g: (C,)."""
    if reduction not in ("mean", "sum"):
        raise ValueError("Invalid reduction type.")
    n, c = logits.shape

    vmem_cap = _tpu_vmem_capacity_bytes()
    is_small_vmem = vmem_cap <= (96 << 20)       # v7x (64 MiB/TC) vs v5e/v6e (128 MiB)
    if parallel_splits is None:
        # One lane-dense partial per TensorCore on v7x; on single-TC chips the extra
        # split only adds padding/flush overhead.
        parallel_splits = 2 if is_small_vmem else 1
    if target_tile_bytes is None:
        target_tile_bytes = (5 << 20) if is_small_vmem else (12 << 20)

    itemsize = jnp.dtype(logits.dtype).itemsize
    padded_c = ((c + 127) // 128) * 128
    # VMEM cost per batch row: lane-padded logits row + lane-padded int32 target row.
    per_row_vmem = padded_c * itemsize + 128 * 4
    row_align = max(8, 8 * (4 // max(1, itemsize)))       # f32: 8, bf16: 16, fp8: 32

    if block_n is None:
        rows = max(row_align, target_tile_bytes // per_row_vmem)
        rows = min(rows, ((n + row_align - 1) // row_align) * row_align)
        block_n = max(row_align, (rows // row_align) * row_align)

    nb = (n + block_n - 1) // block_n
    nb_per_core = (nb + parallel_splits - 1) // parallel_splits
    last_block = nb - 1

    targets_2d = targets.astype(jnp.int32).reshape(n, 1)
    mug_2d = mu_g.reshape(1, c)                 # cast to f32 inside the kernel

    kernel = functools.partial(_ce_norm_kernel, n_total=n, nb_per_core=nb_per_core)

    def tile_map(p, i, _nbc=nb_per_core, _last=last_block):
        # Clamp fully-out-of-range tiles onto the last real block; their rows are
        # masked in-kernel (row_ids computed from the UNCLAMPED tile index).
        return (jnp.minimum(p * _nbc + i, _last), 0)

    # VMEM budget: double-buffered logits + targets tiles, resident muG, headroom.
    logits_tile_vmem = block_n * padded_c * itemsize
    targets_tile_vmem = block_n * 128 * 4
    mug_vmem = 8 * padded_c * 4
    est = 2 * (logits_tile_vmem + targets_tile_vmem) + 2 * mug_vmem + (1 << 20)
    vmem_limit = int(min(max(est + (8 << 20), 32 << 20), vmem_cap - (8 << 20)))
    vmem_limit = max(vmem_limit, 16 << 20)

    out = pl.pallas_call(
        kernel,
        out_shape=jax.ShapeDtypeStruct((1, parallel_splits * 128), jnp.float32),
        grid_spec=pltpu.PrefetchScalarGridSpec(
            num_scalar_prefetch=0,
            grid=(parallel_splits, nb_per_core),
            in_specs=[
                pl.BlockSpec((block_n, c), tile_map),        # logits tile (native dtype)
                pl.BlockSpec((block_n, 1), tile_map),        # targets tile
                pl.BlockSpec((1, c), lambda p, i: (0, 0)),   # resident muG
            ],
            out_specs=pl.BlockSpec((1, 128), lambda p, i: (0, p)),  # lane-dense partials
            scratch_shapes=[pltpu.VMEM((1, 1), jnp.float32)],
        ),
        compiler_params=pltpu.CompilerParams(
            dimension_semantics=("parallel", "arbitrary"),
            vmem_limit_bytes=vmem_limit,
        ),
    )(logits, targets_2d, mug_2d)

    partials = out.reshape(parallel_splits, 128)[:, 0]
    total = jnp.sum(partials)
    if reduction == "mean":
        total = total / jnp.float32(n)
    return total


def _reference(logits, targets, mu_g, reduction="mean"):
    """Pure-JAX reference matching the PyTorch module."""
    logits = logits.astype(jnp.float32)
    logp = jax.nn.log_softmax(logits, axis=-1)
    valid = targets != -1
    safe_t = jnp.where(valid, targets, 0)
    picked = jnp.take_along_axis(logp, safe_t[:, None], axis=-1)[:, 0]
    ce = -jnp.sum(jnp.where(valid, picked, 0.0))
    neg_mask = (targets < 0).astype(jnp.float32)[:, None]
    norm = jnp.sum((logits * neg_mask - mu_g[None, :].astype(jnp.float32)) ** 2)
    total = ce + norm
    return total / logits.shape[0] if reduction == "mean" else total


if __name__ == "__main__":
    key = jax.random.PRNGKey(0)

    ok = True
    # Small cases: ragged N / odd C exercise the in-kernel boundary masking (no jnp.pad),
    # and a bf16 case exercises the native-dtype (no wrapper upcast) path.
    cases = [
        ((16, 32), jnp.float32, "mean", 1e-5),
        ((19, 40), jnp.float32, "sum", 1e-5),
        ((37, 24), jnp.bfloat16, "mean", 1e-3),
    ]
    for (n, c), dt, reduction, tol in cases:
        key, k1, k2 = jax.random.split(key, 3)
        logits = jax.random.normal(k1, (n, c), dtype=jnp.float32).astype(dt)
        targets = jax.random.randint(k2, (n,), 0, c, dtype=jnp.int32)
        targets = targets.at[::4].set(-1)     # deterministically mark "negative" samples
        mu_g = 0.05 * jnp.arange(c, dtype=jnp.float32)   # as if update_muG was called

        loss = custom_ce_norm_loss(logits, targets, mu_g, reduction=reduction)
        loss = jax.block_until_ready(loss)
        ref = _reference(logits, targets, mu_g, reduction=reduction)
        ok = ok and bool(jnp.allclose(loss, ref, rtol=tol, atol=tol))

    assert ok
    print("KERNEL_OK")
</pallas_src>

<mosaic_0001>
module attributes {stable_mosaic.version = 11 : i64} {
  func.func @_ce_norm_kernel(%arg0: i32, %arg1: i32, %arg2: memref<16x32xf32, #tpu.memory_space<vmem>>, %arg3: memref<16x1xi32, #tpu.memory_space<vmem>>, %arg4: memref<1x32xf32, #tpu.memory_space<vmem>>, %arg5: memref<1x128xf32, #tpu.memory_space<vmem>>, %arg6: memref<1x1xf32, #tpu.memory_space<vmem>>) attributes {dimension_semantics = [#tpu.dimension_semantics<parallel>, #tpu.dimension_semantics<arbitrary>], iteration_bounds = array<i64: 2, 1>, scalar_prefetch = 0 : i64, scratch_operands = 1 : i64, tpu.core_type = #tpu.core_type<tc>, window_params = [{transform_indices = @transform_0, window_bounds = array<i64: 16, 32>}, {transform_indices = @transform_1, window_bounds = array<i64: 16, 1>}, {pipeline_mode = #tpu.pipeline_mode<synchronous>, transform_indices = @transform_2, window_bounds = array<i64: 1, 32>}, {transform_indices = @transform_3, window_bounds = array<i64: 1, 128>}]} {
    %c0_i32 = arith.constant 0 : i32
    %0 = arith.cmpi eq, %arg1, %c0_i32 : i32
    %1 = arith.extui %0 : i1 to i32
    %c0_i32_0 = arith.constant 0 : i32
    %2 = arith.cmpi ne, %1, %c0_i32_0 : i32
    scf.if %2 {
      %cst_24 = arith.constant 0.000000e+00 : f32
      %68 = vector.broadcast %cst_24 : f32 to vector<1x1xf32>
      %c0_25 = arith.constant 0 : index
      %c0_26 = arith.constant 0 : index
      %69 = vector.load %arg6[%c0_25, %c0_26] : memref<1x1xf32, #tpu.memory_space<vmem>>, vector<1x1xf32>
      tpu.vector_store %arg6[%c0_25, %c0_26], %68 {strides = array<i32>} : memref<1x1xf32, #tpu.memory_space<vmem>>, vector<1x1xf32>,
    } else {
    }
    %c1_i32 = arith.constant 1 : i32
    %3 = arith.muli %arg0, %c1_i32 : i32
    %4 = arith.addi %3, %arg1 : i32
    %c16_i32 = arith.constant 16 : i32
    %5 = arith.muli %4, %c16_i32 : i32
    %6 = tpu.iota {dimensions = array<i32: 0>} : vector<16x1xi32>
    %7 = vector.broadcast %5 : i32 to vector<16x1xi32>
    %8 = arith.addi %7, %6 : vector<16x1xi32>
    %c16_i32_1 = arith.constant 16 : i32
    %9 = vector.broadcast %c16_i32_1 : i32 to vector<16x1xi32>
    %10 = arith.cmpi slt, %8, %9 : vector<16x1xi32>
    %c0 = arith.constant 0 : index
    %c0_2 = arith.constant 0 : index
    %11 = vector.load %arg2[%c0, %c0_2] : memref<16x32xf32, #tpu.memory_space<vmem>>, vector<16x32xf32>
    %cst = arith.constant 0.000000e+00 : f32
    %12 = vector.shape_cast %10 : vector<16x1xi1> to vector<16x1xi1>
    %13 = vector.broadcast %12 : vector<16x1xi1> to vector<16x32xi1>
    %14 = vector.broadcast %cst : f32 to vector<16x32xf32>
    %15 = arith.select %13, %11, %14 : vector<16x32xi1>, vector<16x32xf32>
    %c0_3 = arith.constant 0 : index
    %c0_4 = arith.constant 0 : index
    %16 = vector.load %arg4[%c0_3, %c0_4] : memref<1x32xf32, #tpu.memory_space<vmem>>, vector<1x32xf32>
    %c0_5 = arith.constant 0 : index
    %c0_6 = arith.constant 0 : index
    %17 = vector.load %arg3[%c0_5, %c0_6] : memref<16x1xi32, #tpu.memory_space<vmem>>, vector<16x1xi32>
    %c-1_i32 = arith.constant -1 : i32
    %18 = vector.broadcast %c-1_i32 : i32 to vector<16x1xi32>
    %19 = arith.cmpi ne, %17, %18 : vector<16x1xi32>
    %cst_7 = arith.constant 1.000000e+00 : f32
    %cst_8 = arith.constant 0.000000e+00 : f32
    %20 = vector.broadcast %cst_7 : f32 to vector<16x1xf32>
    %21 = vector.broadcast %cst_8 : f32 to vector<16x1xf32>
    %22 = arith.select %19, %20, %21 : vector<16x1xi1>, vector<16x1xf32>
    %c0_i32_9 = arith.constant 0 : i32
    %23 = vector.broadcast %c0_i32_9 : i32 to vector<16x1xi32>
    %24 = arith.cmpi slt, %17, %23 : vector<16x1xi32>
    %cst_10 = arith.constant dense<0xFF800000> : vector<16xf32>
    %25 = vector.multi_reduction <maximumf>, %15, %cst_10 [1] : vector<16x32xf32> to vector<16xf32>
    %26 = vector.shape_cast %25 : vector<16xf32> to vector<16x1xf32>
    %27 = vector.broadcast %26 : vector<16x1xf32> to vector<16x32xf32>
    %28 = arith.subf %15, %27 : vector<16x32xf32>
    %29 = math.exp %28 : vector<16x32xf32>
    %cst_11 = arith.constant dense<0.000000e+00> : vector<16xf32>
    %30 = vector.multi_reduction <add>, %29, %cst_11 [1] : vector<16x32xf32> to vector<16xf32>
    %31 = vector.shape_cast %30 : vector<16xf32> to vector<16x1xf32>
    %32 = math.log %31 : vector<16x1xf32>
    %33 = tpu.iota {dimensions = array<i32: 1>} : vector<1x32xi32>
    %34 = vector.broadcast %33 : vector<1x32xi32> to vector<16x32xi32>
    %35 = vector.broadcast %17 : vector<16x1xi32> to vector<16x32xi32>
    %36 = arith.cmpi eq, %34, %35 : vector<16x32xi32>
    %cst_12 = arith.constant 0.000000e+00 : f32
    %37 = vector.broadcast %cst_12 : f32 to vector<16x32xf32>
    %38 = arith.select %36, %28, %37 : vector<16x32xi1>, vector<16x32xf32>
    %cst_13 = arith.constant dense<0.000000e+00> : vector<16xf32>
    %39 = vector.multi_reduction <add>, %38, %cst_13 [1] : vector<16x32xf32> to vector<16xf32>
    %40 = vector.shape_cast %39 : vector<16xf32> to vector<16x1xf32>
    %41 = vector.broadcast %16 : vector<1x32xf32> to vector<16x32xf32>
    %42 = arith.subf %15, %41 : vector<16x32xf32>
    %43 = arith.mulf %42, %42 : vector<16x32xf32>
    %cst_14 = arith.constant dense<0.000000e+00> : vector<16xf32>
    %44 = vector.multi_reduction <add>, %43, %cst_14 [1] : vector<16x32xf32> to vector<16xf32>
    %45 = vector.shape_cast %44 : vector<16xf32> to vector<16x1xf32>
    %46 = arith.mulf %16, %16 : vector<1x32xf32>
    %cst_15 = arith.constant dense<0.000000e+00> : vector<1xf32>
    %47 = vector.multi_reduction <add>, %46, %cst_15 [1] : vector<1x32xf32> to vector<1xf32>
    %48 = vector.shape_cast %47 : vector<1xf32> to vector<1x1xf32>
    %49 = vector.shape_cast %48 : vector<1x1xf32> to vector<1x1xf32>
    %50 = vector.broadcast %49 : vector<1x1xf32> to vector<16x1xf32>
    %51 = arith.select %24, %45, %50 : vector<16x1xi1>, vector<16x1xf32>
    %52 = arith.mulf %22, %32 : vector<16x1xf32>
    %53 = arith.addf %51, %52 : vector<16x1xf32>
    %54 = arith.subf %53, %40 : vector<16x1xf32>
    %cst_16 = arith.constant 0.000000e+00 : f32
    %55 = vector.broadcast %cst_16 : f32 to vector<16x1xf32>
    %56 = arith.select %10, %54, %55 : vector<16x1xi1>, vector<16x1xf32>
    %c0_17 = arith.constant 0 : index
    %c0_18 = arith.constant 0 : index
    %57 = vector.load %arg6[%c0_17, %c0_18] : memref<1x1xf32, #tpu.memory_space<vmem>>, vector<1x1xf32>
    %58 = vector.shape_cast %56 : vector<16x1xf32> to vector<1x16x1xf32>
    %cst_19 = arith.constant dense<0.000000e+00> : vector<1xf32>
    %59 = vector.multi_reduction <add>, %58, %cst_19 [1, 2] : vector<1x16x1xf32> to vector<1xf32>
    %60 = vector.shape_cast %59 : vector<1xf32> to vector<1x1x1xf32>
    %61 = vector.extract %60[0, 0, 0] : f32 from vector<1x1x1xf32>
    %62 = vector.broadcast %61 : f32 to vector<1x1xf32>
    %63 = arith.addf %57, %62 : vector<1x1xf32>
    %c0_20 = arith.constant 0 : index
    %c0_21 = arith.constant 0 : index
    %64 = vector.load %arg6[%c0_20, %c0_21] : memref<1x1xf32, #tpu.memory_space<vmem>>, vector<1x1xf32>
    tpu.vector_store %arg6[%c0_20, %c0_21], %63 {strides = array<i32>} : memref<1x1xf32, #tpu.memory_space<vmem>>, vector<1x1xf32>,
    %c0_i32_22 = arith.constant 0 : i32
    %65 = arith.cmpi eq, %arg1, %c0_i32_22 : i32
    %66 = arith.extui %65 : i1 to i32
    %c0_i32_23 = arith.constant 0 : i32
    %67 = arith.cmpi ne, %66, %c0_i32_23 : i32
    scf.if %67 {
      %c0_24 = arith.constant 0 : index
      %c0_25 = arith.constant 0 : index
      %68 = vector.load %arg6[%c0_24, %c0_25] : memref<1x1xf32, #tpu.memory_space<vmem>>, vector<1x1xf32>
      %69 = vector.shape_cast %68 : vector<1x1xf32> to vector<1x1xf32>
      %70 = vector.broadcast %69 : vector<1x1xf32> to vector<1x128xf32>
      %c0_26 = arith.constant 0 : index
      %c0_27 = arith.constant 0 : index
      %71 = vector.load %arg5[%c0_26, %c0_27] : memref<1x128xf32, #tpu.memory_space<vmem>>, vector<1x128xf32>
      tpu.vector_store %arg5[%c0_26, %c0_27], %70 {strides = array<i32>} : memref<1x128xf32, #tpu.memory_space<vmem>>, vector<1x128xf32>,
    } else {
    }
    return
  }
  func.func @transform_0(%arg0: i32, %arg1: i32) -> (i32, i32) {
    %c1_i32 = arith.constant 1 : i32
    %0 = arith.muli %arg0, %c1_i32 : i32
    %1 = arith.addi %0, %arg1 : i32
    %c0_i32 = arith.constant 0 : i32
    %2 = arith.minsi %1, %c0_i32 : i32
    %c0_i32_0 = arith.constant 0 : i32
    %c0_i32_1 = arith.constant 0 : i32
    return %2, %c0_i32_0 : i32, i32
  }
  func.func @transform_1(%arg0: i32, %arg1: i32) -> (i32, i32) {
    %c1_i32 = arith.constant 1 : i32
    %0 = arith.muli %arg0, %c1_i32 : i32
    %1 = arith.addi %0, %arg1 : i32
    %c0_i32 = arith.constant 0 : i32
    %2 = arith.minsi %1, %c0_i32 : i32
    %c0_i32_0 = arith.constant 0 : i32
    %c0_i32_1 = arith.constant 0 : i32
    return %2, %c0_i32_0 : i32, i32
  }
  func.func @transform_2(%arg0: i32, %arg1: i32) -> (i32, i32) {
    %c0_i32 = arith.constant 0 : i32
    %c0_i32_0 = arith.constant 0 : i32
    %c0_i32_1 = arith.constant 0 : i32
    return %c0_i32, %c0_i32_0 : i32, i32
  }
  func.func @transform_3(%arg0: i32, %arg1: i32) -> (i32, i32) {
    %c0_i32 = arith.constant 0 : i32
    %c0_i32_0 = arith.constant 0 : i32
    return %c0_i32, %arg0 : i32, i32
  }
}

</mosaic_0001>

<bundles_post_ra>
// kernel: tpu_custom_call.1
= control target key start
LH: loop header
LB: loop body
LE: loop exit
PB: predicated region body
PF: predicated region fallthrough
CT: control target
= control target key end

     0   :  { %8 = vsyncpa [#allocation4], 0  ;;  %s824_s0 = inlined_call_operand.vmem [shape: f32[16,32], index: 0, kind: input, shape index: {}]   ;;  %s825_s1 = inlined_call_operand.vmem [shape: s32[16,1], index: 1, kind: input, shape index: {}]   ;;  %s826_s2 = inlined_call_operand.vmem [shape: f32[1,32], index: 2, kind: input, shape index: {}]   ;;  %s827_s3 = inlined_call_operand.hbm [shape: f32[1,256], index: 3, kind: output, shape index: {}]  }
   0x1   :  { %10 = vsyncpa [#allocation4 + $0x1], 0  ;;  %s660_s12 = smov 0   ;;  %s662_s13 = smov 0  }
   0x2   :  { %s664_s14 = smov 0   ;;  %s666_s15 = smov 0  }
   0x3   :  { %s668_s16 = smov 0   ;;  %s670_s17 = smov 0  }
   0x4 LB: > { %s475_s18 = sadd.s32 4294967295, %s635_s17   ;;  %s476_s19 = sadd.s32 4294967294, %s635_s17   ;;  %s635_s17 = sphi %s670_s17, %s16_s17   ;;  %s631_s16 = sphi %s668_s16, %s834_s16   ;;  %s627_s15 = sphi %s666_s15, %s833_s15   ;;  %s623_s14 = sphi %s664_s14, %s832_s14   ;;  %s619_s13 = sphi %s662_s13, %s831_s13   ;;  %s615_s12 = sphi %s660_s12, %s830_s12  }
   0x5   : > { %s28_s20 = sadd.s32 1, %s631_s16  ;;  %s120_s21 = sadd.s32 1, %s623_s14 }
   0x6   : > { %p30_p0 = scmp.ge.s32.totalorder %s28_s20, 2  ;;  %p130_p1 = scmp.ne.s32.totalorder %s623_s14, %s619_s13 }
   0x7   : > { %p131_p2 = scmp.eq.s32.totalorder %s475_s18, 1  ;;  %p136_p3 = scmp.ne.s32.totalorder %s619_s13, %s615_s12 }
   0x8   : > { %s836_s20 = smov (%p30_p0, %s28_s20), 0  ;;  %p137_p5 = scmp.eq.s32.totalorder %s476_s19, 1 }
   0x9   : > { %p700_p4 = por %p131_p2, %p130_p1  ;;  %s117_s23 = ssub.s32 %s631_s16, %s836_s20 }
   0xa   : > { %p479_p6 = scmp.ge.s32.totalorder %s635_s17, 1  ;;  %p118_p7 = scmp.eq.s32.totalorder %s117_s23, 0 }
   0xb   : > { %p707_p8 = por %p137_p5, %p136_p3  ;;  %p188_p9 = scmp.lt.s32.totalorder %s635_s17, 3 }
   0xc   : > { %s713_s25 = scalar_select %p118_p7, %s623_s14, %s120_s21  }
   0xd   : > { %p189_p10 = pnand %p479_p6, %p188_p9 }
   0xe   : > { %p223_p11 = scmp.lt.s32.totalorder (!%p189_p10), %s627_s15, 0  ;;  %s484_s26 = sshll.u32 (!%p189_p10), %s627_s15, 4  ;;  %v254_v0 = vlaneseq (!%p189_p10)  ;;  %vm250_vm0 = vcmask (!%p189_p10), 0   ;;  %v637_v1 = vmov (!%p189_p10), 0   ;;  %v638_v4 = vmov (!%p189_p10), 0.0  }
   0xf   : > { %192 = sbr.rel (%p189_p10) target bundleno = 719 (0x2cf), region = 32  ;;  %547 = vset.pattern.permute.xlu1 (!%p189_p10), %v637_v1  ;;  %548 = vset.pattern.permute.xlu0 (!%p189_p10), %v637_v1  ;;  %v257_v3 = vstv (!%p189_p10), %s484_s26  ;;  %251 = vst.msk [vmem:[#allocation2] sm:$0x1] (!%p189_p10), %vm250_vm0, %v638_v4  ;;  %vm279_vm3 = vcmask (!%p189_p10), 261120   ;;  %v270_v23 = vld [vmem:[%s826_s2] sm:$0x1] (!%p189_p10) }
  0x10   : > { %v255_v2 = vshrl.u32 (!%p189_p10), %v254_v0, 7  ;;  %v336_v25 = vmul.f32 (!%p189_p10), %v270_v23, %v270_v23  ;;  %vm337_vm4 = vcmask (!%p189_p10), 253952   ;;  %v303_v35 = vand.u32 (!%p189_p10), 127, %v254_v0  ;;  %s220_s18 = sand.u32 (!%p189_p10), 1, %s619_s13   ;;  %s639_s4 = smov (!%p189_p10), [#allocation3]  }
  0x11   : > { %vm356_vm11 = vcmask (!%p189_p10), 7168   ;;  %s221_s19 = scalar_lea.vmem (!%p189_p10), [#allocation3], %s220_s18 }
  0x12   : > { %v256_v5 = vadd.s32 (!%p189_p10), 8, %v255_v2  ;;  %v722_v6 = vadd.s32 (!%p189_p10), %v257_v3, %v255_v2  ;;  %v746_v21 = vsub.s32 (!%p189_p10), 0, %v255_v2  ;;  %v338_v29 = vsel (!%p189_p10), %vm337_vm4, %v336_v25, 0.0  ;;  %s400_s21 = sshll.u32 (!%p189_p10), %s221_s19, 4  ;;  %s779_s21 = int_to_ptr.vmem [resolvable:$true] %s400_s21 }
  0x13   : > { %s557_s30 = scalar_lea.vmem (!%p189_p10), %s779_s21, 16 }
  0x14   : > { %v724_v7 = vadd.s32 (!%p189_p10), %v257_v3, %v256_v5  ;;  %vm260_vm1 = vcmp.lt.s32.totalorder (!%p189_p10), %v722_v6, 16  ;;  %v324_v24 = vrot.slane (!%p189_p10), %v270_v23, %v746_v21  ;;  %p558_p13 = scmp.ne.s32.totalorder (!%p189_p10), %s779_s21, %s557_s30 }
  0x16   : > { %s224_s27 = scalar_select %p223_p11, %s627_s15, 0  ;;  %vm261_vm2 = vcmp.lt.s32.totalorder %v724_v7, 16  ;;  %v355_v6 = vld [vmem:[#allocation2] sm:$0x1] }
  0x17   : > { %p559_p0 = pnand %p558_p13, %p700_p4 }
  0x18   : > { %s480_s28 = sshll.u32 %s224_s27, 1 }
  0x19   : > { %p226_p12 = scmp.lt.s32.totalorder %s480_s28, 1  ;;  %p560_p1 = pneg %p559_p0 }
  0x1b   : > { %s838_s28 = smov (!%p226_p12, %s480_s28), 1 }
  0x1c   : > { %s481_s29 = sshll.u32 %s838_s28, 3  ;;  %s777_s28 = scalar_lea.hbm %s827_s3, %s484_s26 }
  0x1d   : > { %s229_s5 = scalar_lea.vmem %s824_s0, %s481_s29  ;;  %s241_s8 = scalar_lea.vmem %s825_s1, %s481_s29 }
  0x1e   : > { %v262_v8 = vld [vmem:[%s229_s5] sm:$0xff]  ;;  %v263_v9 = vld [vmem:[%s229_s5 + $0x8] sm:$0xff]  ;;  %s388_s29 = scalar_lea.sflag [#allocation4], %s220_s18  ;;  %s561_s5 = sshll.u32 %s639_s4, 4  ;;  %s562_s5 = int_to_ptr.vmem [resolvable:$false] %s561_s5 }
  0x1f   : > { %v734_v10 = vld [vmem:[%s241_s8] sm:$0xff]  ;;  %v268_v11 = vsel %vm260_vm1, %v262_v8, 0.0  ;;  %v269_v12 = vsel %vm261_vm2, %v263_v9, 0.0  ;;  %v742_v14 = vld [vmem:[%s241_s8 + $0x8] sm:$0xff]  ;;  %s563_s15 = scalar_lea.vmem %s562_s5, 32  ;;  %p564_p2 = scmp.lt.s32.totalorder %s779_s21, %s562_s5 }
  0x20   : > { %305 = vperm.xlu1 %547, %v734_v10   ;;  %v280_v13 = vsel %vm279_vm3, %v268_v11, -inf  ;;  %v283_v15 = vsel %vm279_vm3, %v269_v12, -inf  ;;  %v326_v26 = vsub.f32 %v268_v11, %v324_v24  ;;  %v327_v31 = vsub.f32 %v269_v12, %v324_v24  ;;  %p565_p3 = scmp.lt.s32.totalorder %s563_s15, %s557_s30 }
  0x21   : > { %281 = vmax.xlane.f32.xlu0 %v280_v13  ;;  %vm273_vm7 = vcmp.ne.s32.totalorder %v734_v10, 4294967295  ;;  %vm274_vm8 = vcmp.ne.s32.totalorder %v742_v14, 4294967295  ;;  %vm277_vm9 = vcmp.lt.s32.totalorder %v734_v10, 0  ;;  %vm278_vm10 = vcmp.lt.s32.totalorder %v742_v14, 0 }
  0x22   : > { %v328_v30 = vmul.f32 %v326_v26, %v326_v26  ;;  %v329_v37 = vmul.f32 %v327_v31, %v327_v31  ;;  %v275_v49 = vsel %vm273_vm7, 1.0, %v638_v4  ;;  %v276_v55 = vsel %vm274_vm8, 1.0, %v638_v4  ;;  %p566_p5 = por %p565_p3, %p564_p2 }
  0x24   : > { %308 = vperm.xlu1 %547, %v742_v14   ;;  %v330_v36 = vsel %vm279_vm3, %v328_v30, 0.0  ;;  %v333_v38 = vsel %vm279_vm3, %v329_v37, 0.0  ;;  %p567_p6 = pnand %p566_p5, %p560_p1 }
  0x25   : > { %284 = vmax.xlane.f32.xlu0 %v283_v15 }
  0x9f   : > { %v306_v34 = vpop.permute.xlu1 %305 }
  0xa0   : > { %vm310_vm5 = vcmp.eq.s32.totalorder %v303_v35, %v306_v34 }
  0xa3   : > { %v309_v39 = vpop.permute.xlu1 %308 }
  0xa4   : > { %vm311_vm6 = vcmp.eq.s32.totalorder %v303_v35, %v309_v39 }
  0xae   : > { %v282_v16 = vpop.xlane.xlu0 %281 }
  0xaf   : > { %v286_v17 = vsub.f32 %v268_v11, %v282_v16 }
  0xb1   : > { %v288_v18 = vmul.f32 1.442695, %v286_v17  ;;  %v312_v40 = vsel %vm310_vm5, %v286_v17, 0.0 }
  0xb2   : > { %v285_v19 = vpop.xlane.xlu0 %284  ;;  %v314_v41 = vsel %vm279_vm3, %v312_v40, 0.0 }
  0xb3   : > { %549 = vpow2.f32 %v288_v18  ;;  %v287_v20 = vsub.f32 %v269_v12, %v285_v19 }
  0xb5   : > { %v290_v22 = vmul.f32 1.442695, %v287_v20  ;;  %v313_v42 = vsel %vm311_vm6, %v287_v20, 0.0 }
  0xb6   : > { %v317_v43 = vsel %vm279_vm3, %v313_v42, 0.0 }
  0xb7   : > { %551 = vpow2.f32 %v290_v22 }
  0xbd   : > { %v550_v27 = vpop.eup %549 }
  0xbe   : > { %v292_v28 = vsel %vm279_vm3, %v550_v27, 0.0 }
  0xbf   : > { %293 = vadd.xlane.f32.xlu0 %v292_v28 }
  0xc1   : > { %v552_v32 = vpop.eup %551 }
  0xc2   : > { %v295_v33 = vsel %vm279_vm3, %v552_v32, 0.0 }
  0xc3   : > { %339 = vadd.xlane.f32.xlu0 %v338_v29  ;;  %296 = vadd.xlane.f32.xlu1 %v295_v33 }
  0xc7   : > { %331 = vadd.xlane.f32.xlu0 %v330_v36 }
  0xcb   : > { %334 = vadd.xlane.f32.xlu0 %v333_v38 }
  0xcf   : > { %315 = vadd.xlane.f32.xlu0 %v314_v41 }
  0xd3   : > { %318 = vadd.xlane.f32.xlu0 %v317_v43 }
 0x14c   : > { %v294_v44 = vpop.xlane.xlu0 %293 }
 0x14d   : > { %553 = vlog2.f32 %v294_v44 }
 0x150   : > { %v297_v45 = vpop.xlane.xlu1 %296  ;;  %v340_v46 = vpop.xlane.xlu0 %339 }
 0x151   : > { %555 = vlog2.f32 %v297_v45  ;;  %v344_v50 = vrot.slane %v340_v46, %v746_v21 }
 0x154   : > { %v332_v47 = vpop.xlane.xlu0 %331 }
 0x155   : > { %v345_v56 = vsel %vm277_vm9, %v332_v47, %v344_v50 }
 0x157   : > { %v554_v48 = vpop.eup %553 }
 0x158   : > { %v299_v51 = vmul.f32 0.6931472, %v554_v48  ;;  %v335_v52 = vpop.xlane.xlu0 %334 }
 0x159   : > { %v346_v62 = vsel %vm278_vm10, %v335_v52, %v344_v50 }
 0x15a   : > { %v347_v53 = vmul.f32 %v299_v51, %v275_v49 }
 0x15b   : > { %v556_v54 = vpop.eup %555 }
 0x15c   : > { %v301_v57 = vmul.f32 0.6931472, %v556_v54  ;;  %v349_v58 = vadd.f32 %v347_v53, %v345_v56  ;;  %v316_v59 = vpop.xlane.xlu0 %315 }
 0x15e   : > { %v351_v60 = vsub.f32 %v349_v58, %v316_v59  ;;  %v348_v61 = vmul.f32 %v301_v57, %v276_v55 }
 0x160   : > { %v350_v63 = vadd.f32 %v348_v61, %v346_v62  ;;  %v319_v0 = vpop.xlane.xlu0 %318  ;;  %v353_v1 = vsel %vm260_vm1, %v351_v60, 0.0 }
 0x161   : > { %v357_v4 = vsel %vm356_vm11, %v353_v1, 0.0 }
 0x162   : > { %v352_v2 = vsub.f32 %v350_v63, %v319_v0 }
 0x164   : > { %v354_v3 = vsel %vm261_vm2, %v352_v2, 0.0 }
 0x165   : > { %v358_v5 = vsel %vm356_vm11, %v354_v3, 0.0 }
 0x166   : > { %v359_v8 = vadd.f32 %v358_v5, %v357_v4 }
 0x168   : > { %360 = vadd.xlane.f32.xlu0 %v359_v8 }
 0x1f5   : > { %v361_v9 = vpop.xlane.xlu0 %360 }
 0x1f6   : > { %v362_v10 = vrot.slane %v361_v9, 4 }
 0x1f8   : > { %v363_v11 = vadd.f32 %v362_v10, %v361_v9 }
 0x1fa   : > { %v364_v12 = vrot.slane %v363_v11, 2 }
 0x1fc   : > { %v365_v13 = vadd.f32 %v364_v12, %v363_v11 }
 0x1fe   : > { %v366_v14 = vrot.slane %v365_v13, 1 }
 0x200   : > { %v367_v15 = vadd.f32 %v366_v14, %v365_v13 }
 0x202   : > { %488 = vpush %v367_v15 }
 0x233   : > { %s489_s11 = spop %488 }
 0x234   : > { %v369_v16 = vstv %s489_s11 }
 0x235   : > { %v370_v7 = vadd.f32 %v369_v16, %v355_v6 }
 0x237   : > { %372 = vst.msk [vmem:[#allocation2] sm:$0x1] %vm250_vm0, %v370_v7 }
 0x23e   : > { %v376_v17 = vld [vmem:[#allocation2] sm:$0x1] }
 0x23f   : > { %379 = vperm.xlu0 %548, %v376_v17  }
 0x2be   : > { %v380_v18 = vpop.permute.xlu0 %379 }
 0x2bf   : > { %v385_v19 = vrot.slane %v380_v18, %v746_v21 }
 0x2c1   : > { %386 = vst [vmem:[%s221_s19] sm:$0x1] %v385_v19 }
 0x2c2   : > { %570 = shalt.err (!%p567_p6)
}
 0x2c3   : > { %s571_s26 = scalar_lea.hbm %s777_s28, 16  ;;  %s575_s8 = scalar_lea.hbm %s827_s3, 32 }
 0x2c4   : > { %p572_p7 = scmp.ne.s32.totalorder %s777_s28, %s571_s26  ;;  %p576_p11 = scmp.lt.u32.totalorder %s777_s28, %s827_s3 }
 0x2c5   : > { %p577_p12 = scmp.lt.u32.totalorder %s575_s8, %s571_s26  ;;  %p579_p0 = scmp.lt.u32.totalorder %s571_s26, %s777_s28 }
 0x2c6   : > { %p573_p9 = pnand %p572_p7, %p700_p4 }
 0x2c7   : > { %p578_p13 = por %p577_p12, %p576_p11 }
 0x2c8   : > { %p574_p10 = pneg %p573_p9 }
 0x2c9   : > { %p580_p1 = por %p579_p0, %p578_p13 }
 0x2cb   : > { %p581_p2 = pnand %p580_p1, %p574_p10 }
 0x2cd   : > { %584 = shalt.err (!%p581_p2)
}
 0x2ce   : > { %490 = dma.vmem_to_hbm [thread:$0]  (%p700_p4), %s779_s21, 16, %s777_s28, %s388_s29  }
 0x2cf PF: > { %p496_p3 = scmp.ge.s32.totalorder %s635_s17, 2  ;;  %s412_s11 = sand.u32 1, %s615_s12  }
 0x2d0   : > { %s413_s18 = scalar_lea.sflag [#allocation4], %s412_s11 }
 0x2d1   : > { %p493_p5 = pnand %p496_p3, %p707_p8 }
 0x2d3   : > { %610 = dma.done.wait (!%p493_p5), %s413_s18, 16  }
 0x2d4   : > { %612 = vsyncadd (!%p493_p5), %s413_s18, 4294967280  ;;  %s16_s17 = sadd.s32 1, %s635_s17   ;;  %s830_s12 = smov %s619_s13 }
 0x2d5   : > { %p13_p6 = scmp.ge.s32.totalorder %s16_s17, 4   ;;  %s831_s13 = smov %s623_s14 }
 0x2d6   : > { %s832_s14 = smov %s713_s25  ;;  %s833_s15 = smov %s631_s16 }
 0x2d7   : > { %s834_s16 = smov %s836_s20  ;;  %15 = sbr.rel (!%p13_p6) target bundleno = 4 (0x4), region = 78 }
 0x2de   :  { %417 = vsyncpa [#allocation4], 1 }
 0x2df   :  { %419 = vsyncpa [#allocation4 + $0x1], 1 }

</bundles_post_ra>
